<compile_context>
chip_gen: v5e
topology: v5e:2x2
jax: 0.10.0
libtpu: 0.0.40
codegen_flags: <defaults>
</compile_context>

<pallas_src>
import jax
import jax.numpy as jnp
from jax.experimental import pallas as pl
from jax.experimental.pallas import tpu as pltpu


def _dma_identity_kernel(x_hbm_ref, o_hbm_ref, sem):
    # Whole-array HBM -> HBM copy on the DMA engine. No VMEM roundtrip,
    # no TensorCore vector slots used.
    copy = pltpu.make_async_copy(x_hbm_ref, o_hbm_ref, sem)
    copy.start()
    copy.wait()


@jax.jit
def _pallas_identity_copy(x: jax.Array) -> jax.Array:
    """Materialize the identity as a single HBM->HBM DMA copy via Pallas."""
    return pl.pallas_call(
        _dma_identity_kernel,
        out_shape=jax.ShapeDtypeStruct(x.shape, x.dtype),
        in_specs=[pl.BlockSpec(memory_space=pl.ANY)],
        out_specs=pl.BlockSpec(memory_space=pl.ANY),
        scratch_shapes=[pltpu.SemaphoreType.DMA(())],
    )(x)


def cnn_rr_encoder_forward(x: jax.Array, *, force_pallas: bool = False) -> jax.Array:
    """Identity forward pass of CNN_RR_Encoder.

    Default (fast) path returns `x` unchanged — the module has no parameters
    and no computation, so this is the optimal implementation on every TPU
    generation. Set `force_pallas=True` to route through the Pallas DMA copy
    kernel (e.g. to force a fresh output buffer).
    """
    if not force_pallas:
        return x
    if x.size == 0:
        return x
    return _pallas_identity_copy(x)


if __name__ == "__main__":
    key = jax.random.PRNGKey(0)
    # Small NCHW input consistent with a CNN encoder: batch=2, channels=4, 16x16 spatial.
    shape = (2, 4, 16, 16)
    x = jax.random.normal(key, shape, dtype=jnp.float32)

    # Fast path (what callers should use): pure identity, no kernel launch.
    y_fast = cnn_rr_encoder_forward(x)
    assert y_fast.shape == x.shape and y_fast.dtype == x.dtype

    # Exercise the Pallas DMA copy kernel once and verify exact identity.
    y_kernel = cnn_rr_encoder_forward(x, force_pallas=True)
    y_kernel = jax.block_until_ready(y_kernel)

    assert y_kernel.shape == x.shape and y_kernel.dtype == x.dtype
    assert bool(jnp.array_equal(y_kernel, x))
    assert bool(jnp.array_equal(y_fast, x))
    print("KERNEL_OK")
</pallas_src>

<mosaic_0001>
module attributes {stable_mosaic.version = 11 : i64} {
  func.func @_dma_identity_kernel(%arg0: memref<2x4x16x16xf32, #tpu.memory_space<any>>, %arg1: memref<2x4x16x16xf32, #tpu.memory_space<any>>, %arg2: memref<!tpu.dma_semaphore, #tpu.memory_space<semaphore_mem>>) attributes {dimension_semantics = [], scalar_prefetch = 0 : i64, scratch_operands = 1 : i64, tpu.core_type = #tpu.core_type<tc>} {
    tpu.enqueue_dma source(%arg0 : memref<2x4x16x16xf32, #tpu.memory_space<any>>) target(%arg1 : memref<2x4x16x16xf32, #tpu.memory_space<any>>) target_semaphore(%arg2 : memref<!tpu.dma_semaphore, #tpu.memory_space<semaphore_mem>>)
    tpu.wait_dma2 semaphore(%arg2 : memref<!tpu.dma_semaphore, #tpu.memory_space<semaphore_mem>>) src(%arg0 : memref<2x4x16x16xf32, #tpu.memory_space<any>>) dst(%arg1 : memref<2x4x16x16xf32, #tpu.memory_space<any>>)
    return
  }
}

</mosaic_0001>

<bundles_post_ra>
// kernel: _pallas_identity_copy.1
= control target key start
LH: loop header
LB: loop body
LE: loop exit
PB: predicated region body
PF: predicated region fallthrough
CT: control target
= control target key end

     0   :  { %s34_s12 = smov [#allocation2]   ;;  %s35_s13 = smov [#allocation3]   ;;  %s53_s0 = inlined_call_operand.hbm [shape: f32[2,4,16,16], index: 0, kind: input, shape index: {}]   ;;  %s54_s1 = inlined_call_operand.hbm [shape: f32[2,4,16,16], index: 1, kind: output, shape index: {}]  }
   0x1   :  { %s10_s8 = sshll.u32 %s53_s0, 4  ;;  %s12_s11 = sshll.u32 %s54_s1, 4  ;;  %s11_s8 = int_to_ptr.hbm [resolvable:$true] %s10_s8  ;;  %s13_s11 = int_to_ptr.hbm [resolvable:$true] %s12_s11 }
   0x2   :  { %s36_s14 = smov 0  }
   0x3   :  { %16 = dma.general %s11_s8, 2048, %s13_s11, %s34_s12, %s35_s13, [#allocation4], %s36_s14, 0  }
   0x4   :  { %32 = dma.done.wait [#allocation2], 2048 }
   0x5   :  { %33 = vsyncadd [#allocation2], 4294965248 }
   0x6   :  { %22 = vsyncmov [#allocation2] }
   0x9   :  { %s23_s15 = vpop.sfrf %22 }
   0xa   :  { %p28_p0 = scmp.ne.s32.totalorder %s23_s15, 0 }
   0xc   :  { %27 = shalt.err (%p28_p0)  }

</bundles_post_ra>
